<compile_context>
chip_gen: v5e
topology: v5e:2x2
jax: 0.10.0
libtpu: 0.0.40
codegen_flags: <defaults>
</compile_context>

<pallas_src>
import jax
import jax.numpy as jnp
from jax.experimental import pallas as pl
from jax.experimental.pallas import tpu as pltpu


_OUT_LANES = 128  # lane-dense output width; wrapper slices column 0


def _critic_kernel(s_ref, a_ref, w1s_ref, w1a_ref, b1_ref, w2_ref, b2_ref,
                   w3_ref, b3_ref, q_ref):
    # Layer 1: split matmul replaces cat((s, a)) @ W1  (same f32 accumulator).
    h1 = (jnp.dot(s_ref[...], w1s_ref[...], preferred_element_type=jnp.float32)
          + jnp.dot(a_ref[...], w1a_ref[...], preferred_element_type=jnp.float32)
          + b1_ref[...])
    h1 = jnp.maximum(h1, 0.0)
    # Layer 2
    h2 = jnp.dot(h1, w2_ref[...], preferred_element_type=jnp.float32) + b2_ref[...]
    h2 = jnp.maximum(h2, 0.0)
    # Layer 3 (W3 zero-padded to 128 lanes -> full-lane, unmasked store)
    q = jnp.dot(h2, w3_ref[...], preferred_element_type=jnp.float32) + b3_ref[...]
    q_ref[...] = q.astype(q_ref.dtype)


def _tile_rows(B):
    """Batch-tile rows: big tiles, >=2 tiles once B >= 128 (v7x megacore)."""
    preferred = 512
    rounded = ((B + 7) // 8) * 8
    if B < 128:
        return rounded
    half = ((-(-B // 2)) + 7) // 8 * 8   # round_up(ceil(B/2), 8)
    return min(preferred, half, rounded)


@jax.jit
def critic_forward(s, a, w1, b1, w2, b2, w3, b3):
    """Q(s, a) of the SAC Critic.

    s:  (B, state_dims)  float32
    a:  (B, action_dims) float32
    w1: (state_dims + action_dims, H), b1: (H,)
    w2: (H, H),                        b2: (H,)
    w3: (H, 1),                        b3: (1,)
    returns q: (B, 1) float32
    """
    B, S = s.shape
    A = a.shape[1]
    H = w1.shape[1]

    block_b = _tile_rows(B)
    n_tiles = pl.cdiv(B, block_b)
    B_pad = n_tiles * block_b
    if B_pad != B:
        s = jnp.pad(s, ((0, B_pad - B), (0, 0)))
        a = jnp.pad(a, ((0, B_pad - B), (0, 0)))

    # Static split of W1 so the kernel never needs the concatenated input.
    w1s = w1[:S]          # (S, H)
    w1a = w1[S:]          # (A, H)

    b1_2d = b1.reshape(1, H)
    b2_2d = b2.reshape(1, H)

    # Zero-pad layer-3 weight/bias to 128 output lanes (lane-dense store).
    w3_pad = jnp.pad(w3, ((0, 0), (0, _OUT_LANES - w3.shape[1])))   # (H, 128)
    b3_pad = jnp.pad(b3.reshape(1, -1),
                     ((0, 0), (0, _OUT_LANES - b3.shape[0])))        # (1, 128)

    const = lambda shape: pl.BlockSpec(shape, lambda i: (0, 0))

    q = pl.pallas_call(
        _critic_kernel,
        out_shape=jax.ShapeDtypeStruct((B_pad, _OUT_LANES), jnp.float32),
        grid_spec=pltpu.PrefetchScalarGridSpec(
            num_scalar_prefetch=0,
            grid=(n_tiles,),
            in_specs=[
                pl.BlockSpec((block_b, S), lambda i: (i, 0)),  # s tile
                pl.BlockSpec((block_b, A), lambda i: (i, 0)),  # a tile
                const((S, H)),            # W1[:S]   (VMEM resident)
                const((A, H)),            # W1[S:]   (VMEM resident)
                const((1, H)),            # b1
                const((H, H)),            # W2       (VMEM resident)
                const((1, H)),            # b2
                const((H, _OUT_LANES)),   # W3 zero-padded to 128 lanes
                const((1, _OUT_LANES)),   # b3 zero-padded
            ],
            out_specs=pl.BlockSpec((block_b, _OUT_LANES), lambda i: (i, 0)),
        ),
        compiler_params=pltpu.CompilerParams(
            dimension_semantics=("parallel",),
            vmem_limit_bytes=32 << 20,    # explicit; safe on v5e/v6e/v7x
        ),
    )(s, a, w1s, w1a, b1_2d, w2, b2_2d, w3_pad, b3_pad)

    # Slice off batch padding and keep only the real Q column.
    return q[:B, :1]


def _orthogonal(key, out_features, in_features):
    """Mimics nn.init.orthogonal_ on a (out, in) weight, deterministically."""
    rows, cols = out_features, in_features
    a = jax.random.normal(key, (max(rows, cols), min(rows, cols)), jnp.float32)
    q, r = jnp.linalg.qr(a)
    q = q * jnp.sign(jnp.diag(r))  # make decomposition unique
    if rows < cols:
        q = q.T
    return q[:rows, :cols]


def _reference_forward(s, a, w1, b1, w2, b2, w3, b3):
    sa = jnp.concatenate([s, a], axis=-1)
    h1 = jnp.maximum(sa @ w1 + b1, 0.0)
    h2 = jnp.maximum(h1 @ w2 + b2, 0.0)
    return h2 @ w3 + b3


if __name__ == "__main__":
    # Small shapes consistent with Critic(state_dims, action_dims, hidden_dims)
    B, state_dims, action_dims, hidden = 16, 32, 8, 128

    key = jax.random.PRNGKey(0)
    k_s, k_a, k1, k2, k3 = jax.random.split(key, 5)

    s = jax.random.normal(k_s, (B, state_dims), jnp.float32)
    a = jax.random.normal(k_a, (B, action_dims), jnp.float32)

    # PyTorch Linear weights are (out, in), orthogonal-initialized, bias = 0.
    w1 = _orthogonal(k1, hidden, state_dims + action_dims).T  # (S+A, hidden)
    b1 = jnp.zeros((hidden,), jnp.float32)
    w2 = _orthogonal(k2, hidden, hidden).T                    # (hidden, hidden)
    b2 = jnp.zeros((hidden,), jnp.float32)
    w3 = _orthogonal(k3, 1, hidden).T                         # (hidden, 1)
    b3 = jnp.zeros((1,), jnp.float32)

    q = critic_forward(s, a, w1, b1, w2, b2, w3, b3)
    jax.block_until_ready(q)
    q_ref = _reference_forward(s, a, w1, b1, w2, b2, w3, b3)
    assert q.shape == (B, 1)
    assert jnp.allclose(q, q_ref, atol=1e-5, rtol=1e-5)

    # Non-multiple-of-8 batch (padded path).
    B2 = 13
    s2 = jax.random.normal(jax.random.PRNGKey(7), (B2, state_dims), jnp.float32)
    a2 = jax.random.normal(jax.random.PRNGKey(8), (B2, action_dims), jnp.float32)
    q2 = critic_forward(s2, a2, w1, b1, w2, b2, w3, b3)
    jax.block_until_ready(q2)
    q2_ref = _reference_forward(s2, a2, w1, b1, w2, b2, w3, b3)
    assert q2.shape == (B2, 1)
    assert jnp.allclose(q2, q2_ref, atol=1e-5, rtol=1e-5)

    # Larger, non-divisible batch -> multi-tile grid (>=2 tiles, padded rows).
    B3 = 300
    s3 = jax.random.normal(jax.random.PRNGKey(9), (B3, state_dims), jnp.float32)
    a3 = jax.random.normal(jax.random.PRNGKey(10), (B3, action_dims), jnp.float32)
    q3 = critic_forward(s3, a3, w1, b1, w2, b2, w3, b3)
    jax.block_until_ready(q3)
    q3_ref = _reference_forward(s3, a3, w1, b1, w2, b2, w3, b3)
    assert q3.shape == (B3, 1)
    assert jnp.allclose(q3, q3_ref, atol=1e-5, rtol=1e-5)

    print("KERNEL_OK")
</pallas_src>

<mosaic_0001>
module attributes {stable_mosaic.version = 11 : i64} {
  func.func @_critic_kernel(%arg0: i32, %arg1: memref<16x32xf32, #tpu.memory_space<vmem>>, %arg2: memref<16x8xf32, #tpu.memory_space<vmem>>, %arg3: memref<32x128xf32, #tpu.memory_space<vmem>>, %arg4: memref<8x128xf32, #tpu.memory_space<vmem>>, %arg5: memref<1x128xf32, #tpu.memory_space<vmem>>, %arg6: memref<128x128xf32, #tpu.memory_space<vmem>>, %arg7: memref<1x128xf32, #tpu.memory_space<vmem>>, %arg8: memref<128x128xf32, #tpu.memory_space<vmem>>, %arg9: memref<1x128xf32, #tpu.memory_space<vmem>>, %arg10: memref<16x128xf32, #tpu.memory_space<vmem>>) attributes {dimension_semantics = [#tpu.dimension_semantics<parallel>], iteration_bounds = array<i64: 1>, scalar_prefetch = 0 : i64, scratch_operands = 0 : i64, tpu.core_type = #tpu.core_type<tc>, window_params = [{transform_indices = @transform_0, window_bounds = array<i64: 16, 32>}, {transform_indices = @transform_1, window_bounds = array<i64: 16, 8>}, {pipeline_mode = #tpu.pipeline_mode<synchronous>, transform_indices = @transform_2, window_bounds = array<i64: 32, 128>}, {pipeline_mode = #tpu.pipeline_mode<synchronous>, transform_indices = @transform_3, window_bounds = array<i64: 8, 128>}, {pipeline_mode = #tpu.pipeline_mode<synchronous>, transform_indices = @transform_4, window_bounds = array<i64: 1, 128>}, {pipeline_mode = #tpu.pipeline_mode<synchronous>, transform_indices = @transform_5, window_bounds = array<i64: 128, 128>}, {pipeline_mode = #tpu.pipeline_mode<synchronous>, transform_indices = @transform_6, window_bounds = array<i64: 1, 128>}, {pipeline_mode = #tpu.pipeline_mode<synchronous>, transform_indices = @transform_7, window_bounds = array<i64: 128, 128>}, {pipeline_mode = #tpu.pipeline_mode<synchronous>, transform_indices = @transform_8, window_bounds = array<i64: 1, 128>}, {transform_indices = @transform_9, window_bounds = array<i64: 16, 128>}]} {
    %c0 = arith.constant 0 : index
    %c0_0 = arith.constant 0 : index
    %0 = vector.load %arg1[%c0, %c0_0] : memref<16x32xf32, #tpu.memory_space<vmem>>, vector<16x32xf32>
    %c0_1 = arith.constant 0 : index
    %c0_2 = arith.constant 0 : index
    %1 = vector.load %arg3[%c0_1, %c0_2] : memref<32x128xf32, #tpu.memory_space<vmem>>, vector<32x128xf32>
    %cst = arith.constant dense<0.000000e+00> : vector<16x128xf32>
    %2 = tpu.matmul %0, %1, %cst {dimension_numbers = #tpu.dot_dimension_numbers<[1], [0], [0], [1], [0, 0, 1, 1], [], []>} : vector<16x32xf32>, vector<32x128xf32>, vector<16x128xf32> -> vector<16x128xf32>
    %c0_3 = arith.constant 0 : index
    %c0_4 = arith.constant 0 : index
    %3 = vector.load %arg2[%c0_3, %c0_4] : memref<16x8xf32, #tpu.memory_space<vmem>>, vector<16x8xf32>
    %c0_5 = arith.constant 0 : index
    %c0_6 = arith.constant 0 : index
    %4 = vector.load %arg4[%c0_5, %c0_6] : memref<8x128xf32, #tpu.memory_space<vmem>>, vector<8x128xf32>
    %cst_7 = arith.constant dense<0.000000e+00> : vector<16x128xf32>
    %5 = tpu.matmul %3, %4, %cst_7 {dimension_numbers = #tpu.dot_dimension_numbers<[1], [0], [0], [1], [0, 0, 1, 1], [], []>} : vector<16x8xf32>, vector<8x128xf32>, vector<16x128xf32> -> vector<16x128xf32>
    %6 = arith.addf %2, %5 : vector<16x128xf32>
    %c0_8 = arith.constant 0 : index
    %c0_9 = arith.constant 0 : index
    %7 = vector.load %arg5[%c0_8, %c0_9] : memref<1x128xf32, #tpu.memory_space<vmem>>, vector<1x128xf32>
    %8 = vector.broadcast %7 : vector<1x128xf32> to vector<16x128xf32>
    %9 = arith.addf %6, %8 : vector<16x128xf32>
    %cst_10 = arith.constant 0.000000e+00 : f32
    %10 = vector.broadcast %cst_10 : f32 to vector<16x128xf32>
    %11 = arith.maximumf %9, %10 : vector<16x128xf32>
    %c0_11 = arith.constant 0 : index
    %c0_12 = arith.constant 0 : index
    %12 = vector.load %arg6[%c0_11, %c0_12] : memref<128x128xf32, #tpu.memory_space<vmem>>, vector<128x128xf32>
    %cst_13 = arith.constant dense<0.000000e+00> : vector<16x128xf32>
    %13 = tpu.matmul %11, %12, %cst_13 {dimension_numbers = #tpu.dot_dimension_numbers<[1], [0], [0], [1], [0, 0, 1, 1], [], []>} : vector<16x128xf32>, vector<128x128xf32>, vector<16x128xf32> -> vector<16x128xf32>
    %c0_14 = arith.constant 0 : index
    %c0_15 = arith.constant 0 : index
    %14 = vector.load %arg7[%c0_14, %c0_15] : memref<1x128xf32, #tpu.memory_space<vmem>>, vector<1x128xf32>
    %15 = vector.broadcast %14 : vector<1x128xf32> to vector<16x128xf32>
    %16 = arith.addf %13, %15 : vector<16x128xf32>
    %cst_16 = arith.constant 0.000000e+00 : f32
    %17 = vector.broadcast %cst_16 : f32 to vector<16x128xf32>
    %18 = arith.maximumf %16, %17 : vector<16x128xf32>
    %c0_17 = arith.constant 0 : index
    %c0_18 = arith.constant 0 : index
    %19 = vector.load %arg8[%c0_17, %c0_18] : memref<128x128xf32, #tpu.memory_space<vmem>>, vector<128x128xf32>
    %cst_19 = arith.constant dense<0.000000e+00> : vector<16x128xf32>
    %20 = tpu.matmul %18, %19, %cst_19 {dimension_numbers = #tpu.dot_dimension_numbers<[1], [0], [0], [1], [0, 0, 1, 1], [], []>} : vector<16x128xf32>, vector<128x128xf32>, vector<16x128xf32> -> vector<16x128xf32>
    %c0_20 = arith.constant 0 : index
    %c0_21 = arith.constant 0 : index
    %21 = vector.load %arg9[%c0_20, %c0_21] : memref<1x128xf32, #tpu.memory_space<vmem>>, vector<1x128xf32>
    %22 = vector.broadcast %21 : vector<1x128xf32> to vector<16x128xf32>
    %23 = arith.addf %20, %22 : vector<16x128xf32>
    %c0_22 = arith.constant 0 : index
    %c0_23 = arith.constant 0 : index
    %24 = vector.load %arg10[%c0_22, %c0_23] : memref<16x128xf32, #tpu.memory_space<vmem>>, vector<16x128xf32>
    tpu.vector_store %arg10[%c0_22, %c0_23], %23 {strides = array<i32>} : memref<16x128xf32, #tpu.memory_space<vmem>>, vector<16x128xf32>,
    return
  }
  func.func @transform_0(%arg0: i32) -> (i32, i32) {
    %c0_i32 = arith.constant 0 : i32
    %c0_i32_0 = arith.constant 0 : i32
    return %arg0, %c0_i32 : i32, i32
  }
  func.func @transform_1(%arg0: i32) -> (i32, i32) {
    %c0_i32 = arith.constant 0 : i32
    %c0_i32_0 = arith.constant 0 : i32
    return %arg0, %c0_i32 : i32, i32
  }
  func.func @transform_2(%arg0: i32) -> (i32, i32) {
    %c0_i32 = arith.constant 0 : i32
    %c0_i32_0 = arith.constant 0 : i32
    %c0_i32_1 = arith.constant 0 : i32
    return %c0_i32, %c0_i32_0 : i32, i32
  }
  func.func @transform_3(%arg0: i32) -> (i32, i32) {
    %c0_i32 = arith.constant 0 : i32
    %c0_i32_0 = arith.constant 0 : i32
    %c0_i32_1 = arith.constant 0 : i32
    return %c0_i32, %c0_i32_0 : i32, i32
  }
  func.func @transform_4(%arg0: i32) -> (i32, i32) {
    %c0_i32 = arith.constant 0 : i32
    %c0_i32_0 = arith.constant 0 : i32
    %c0_i32_1 = arith.constant 0 : i32
    return %c0_i32, %c0_i32_0 : i32, i32
  }
  func.func @transform_5(%arg0: i32) -> (i32, i32) {
    %c0_i32 = arith.constant 0 : i32
    %c0_i32_0 = arith.constant 0 : i32
    %c0_i32_1 = arith.constant 0 : i32
    return %c0_i32, %c0_i32_0 : i32, i32
  }
  func.func @transform_6(%arg0: i32) -> (i32, i32) {
    %c0_i32 = arith.constant 0 : i32
    %c0_i32_0 = arith.constant 0 : i32
    %c0_i32_1 = arith.constant 0 : i32
    return %c0_i32, %c0_i32_0 : i32, i32
  }
  func.func @transform_7(%arg0: i32) -> (i32, i32) {
    %c0_i32 = arith.constant 0 : i32
    %c0_i32_0 = arith.constant 0 : i32
    %c0_i32_1 = arith.constant 0 : i32
    return %c0_i32, %c0_i32_0 : i32, i32
  }
  func.func @transform_8(%arg0: i32) -> (i32, i32) {
    %c0_i32 = arith.constant 0 : i32
    %c0_i32_0 = arith.constant 0 : i32
    %c0_i32_1 = arith.constant 0 : i32
    return %c0_i32, %c0_i32_0 : i32, i32
  }
  func.func @transform_9(%arg0: i32) -> (i32, i32) {
    %c0_i32 = arith.constant 0 : i32
    %c0_i32_0 = arith.constant 0 : i32
    return %arg0, %c0_i32 : i32, i32
  }
}

</mosaic_0001>

<bundles_post_ra>
// kernel: critic_forward.1
= control target key start
LH: loop header
LB: loop body
LE: loop exit
PB: predicated region body
PF: predicated region fallthrough
CT: control target
= control target key end

     0   :  { %vm41_vm0 = vcmask 64512   ;;  %vm71_vm1 = vcmask 261120   ;;  %s418_s2 = inlined_call_operand.vmem [shape: f32[32,128], index: 2, kind: input, shape index: {}]   ;;  %s419_s3 = inlined_call_operand.vmem [shape: f32[8,128], index: 3, kind: input, shape index: {}]   ;;  %s420_s1 = inlined_call_operand.vmem [shape: f32[16,8], index: 1, kind: input, shape index: {}]   ;;  %s421_s5 = inlined_call_operand.vmem [shape: f32[128,128], index: 5, kind: input, shape index: {}]   ;;  %s422_s0 = inlined_call_operand.vmem [shape: f32[16,32], index: 0, kind: input, shape index: {}]   ;;  %s423_s4 = inlined_call_operand.vmem [shape: f32[1,128], index: 4, kind: input, shape index: {}]   ;;  %s424_s6 = inlined_call_operand.vmem [shape: f32[1,128], index: 6, kind: input, shape index: {}]   ;;  %s425_s7 = inlined_call_operand.vmem [shape: f32[128,128], index: 7, kind: input, shape index: {}]   ;;  %s426_s8 = inlined_call_operand.vmem [shape: f32[1,128], index: 8, kind: input, shape index: {}]   ;;  %s427_s9 = inlined_call_operand.vmem [shape: f32[16,128], index: 9, kind: output, shape index: {}]  }
   0x1   :  { %v37_v0 = vld [vmem:[%s418_s2 + $0x18] sm:$0xff]  ;;  %v36_v1 = vld [vmem:[%s418_s2 + $0x10] sm:$0xff]  ;;  %v40_v2 = vld [vmem:[%s419_s3] sm:$0xff] }
   0x2   :  { %90 = vmatpush.msra.mxu1 %v37_v0  ;;  %v38_v3 = vld [vmem:[%s420_s1] sm:$0xff]  ;;  %v35_v4 = vld [vmem:[%s418_s2 + $0x8] sm:$0xff]  ;;  %63 = vmatpush.msra.mxu0 %v40_v2  ;;  %v124_v5 = vld [vmem:[%s421_s5 + $0x78] sm:$0xff] }
   0x3   :  { %203 = vmatmul.msk.f32.vlgmr.msra.gmra.mxu0 %vm41_vm0, %v38_v3  ;;  %v123_v6 = vld [vmem:[%s421_s5 + $0x70] sm:$0xff]  ;;  %v34_v7 = vld [vmem:[%s418_s2] sm:$0xff]  ;;  %207 = vmatpush.msra.mxu2 %v124_v5  ;;  %v122_v9 = vld [vmem:[%s421_s5 + $0x68] sm:$0xff] }
   0x4   :  { %91 = vmatpush.msra.mxu1 %v36_v1  ;;  %129 = vmatpush.msrb.mxu0 %v124_v5  ;;  %v32_v8 = vld [vmem:[%s422_s0] sm:$0xff]  ;;  %v39_v11 = vld [vmem:[%s420_s1 + $0x8] sm:$0xff]  ;;  %v120_v12 = vld [vmem:[%s421_s5 + $0x58] sm:$0xff] }
   0x5   :  { %208 = vmatpush.msra.mxu2 %v123_v6  ;;  %v121_v10 = vld [vmem:[%s421_s5 + $0x60] sm:$0xff]  ;;  %v119_v13 = vld [vmem:[%s421_s5 + $0x50] sm:$0xff]  ;;  %v33_v14 = vld [vmem:[%s422_s0 + $0x8] sm:$0xff] }
   0x6   :  { %92 = vmatpush.msra.mxu1 %v35_v4  ;;  %130 = vmatpush.msrb.mxu0 %v123_v6  ;;  %v118_v15 = vld [vmem:[%s421_s5 + $0x48] sm:$0xff]  ;;  %v117_v16 = vld [vmem:[%s421_s5 + $0x40] sm:$0xff]  ;;  %v116_v17 = vld [vmem:[%s421_s5 + $0x38] sm:$0xff] }
   0x7   :  { %209 = vmatpush.msra.mxu2 %v122_v9  ;;  %v115_v18 = vld [vmem:[%s421_s5 + $0x30] sm:$0xff]  ;;  %v114_v19 = vld [vmem:[%s421_s5 + $0x28] sm:$0xff]  ;;  %v113_v20 = vld [vmem:[%s421_s5 + $0x20] sm:$0xff] }
   0x8   :  { %93 = vmatpush.msra.mxu1 %v34_v7  ;;  %131 = vmatpush.msrb.mxu0 %v122_v9  ;;  %v112_v21 = vld [vmem:[%s421_s5 + $0x18] sm:$0xff]  ;;  %v111_v22 = vld [vmem:[%s421_s5 + $0x10] sm:$0xff]  ;;  %v110_v23 = vld [vmem:[%s421_s5 + $0x8] sm:$0xff] }
   0x9   :  { %205 = vmatmul.msk.f32.vlgmr.msra.gmra.mxu1 %vm71_vm1, %v32_v8  ;;  %210 = vmatpush.msra.mxu2 %v121_v10  ;;  %v109_v24 = vld [vmem:[%s421_s5] sm:$0xff]  ;;  %v169_v25 = vld [vmem:[%s425_s7 + $0x78] sm:$0xff]  ;;  %v168_v26 = vld [vmem:[%s425_s7 + $0x70] sm:$0xff] }
   0xa   :  { %132 = vmatpush.msrb.mxu0 %v121_v10  ;;  %174 = vmatpush.msra.mxu3 %v169_v25  ;;  %v167_v27 = vld [vmem:[%s425_s7 + $0x68] sm:$0xff]  ;;  %v166_v28 = vld [vmem:[%s425_s7 + $0x60] sm:$0xff]  ;;  %v165_v29 = vld [vmem:[%s425_s7 + $0x58] sm:$0xff] }
   0xb   :  { %204 = vmatmul.msk.f32.gmra.mxu0 %vm41_vm0, %v39_v11  ;;  %211 = vmatpush.msra.mxu2 %v120_v12  ;;  %v164_v30 = vld [vmem:[%s425_s7 + $0x50] sm:$0xff]  ;;  %v163_v31 = vld [vmem:[%s425_s7 + $0x48] sm:$0xff]  ;;  %v162_v32 = vld [vmem:[%s425_s7 + $0x40] sm:$0xff] }
   0xc   :  { %133 = vmatpush.msrb.mxu0 %v120_v12  ;;  %175 = vmatpush.msra.mxu3 %v168_v26  ;;  %v161_v34 = vld [vmem:[%s425_s7 + $0x38] sm:$0xff]  ;;  %v223_v35 = vld [vmem:[%s423_s4] ss:$0 sm:$0xff]  ;;  %v160_v36 = vld [vmem:[%s425_s7 + $0x30] sm:$0xff] }
   0xd   :  { %212 = vmatpush.msra.mxu2 %v119_v13  ;;  %v159_v39 = vld [vmem:[%s425_s7 + $0x28] sm:$0xff]  ;;  %v158_v41 = vld [vmem:[%s425_s7 + $0x20] sm:$0xff]  ;;  %v157_v43 = vld [vmem:[%s425_s7 + $0x18] sm:$0xff] }
   0xe   :  { %134 = vmatpush.msrb.mxu0 %v119_v13  ;;  %176 = vmatpush.msra.mxu3 %v167_v27  ;;  %v156_v49 = vld [vmem:[%s425_s7 + $0x10] sm:$0xff]  ;;  %v155_v50 = vld [vmem:[%s425_s7 + $0x8] sm:$0xff]  ;;  %v154_v51 = vld [vmem:[%s425_s7] sm:$0xff] }
   0xf   :  { %213 = vmatpush.msra.mxu2 %v118_v15  ;;  %v224_v52 = vld [vmem:[%s424_s6] ss:$0 sm:$0xff] }
  0x10   :  { %135 = vmatpush.msrb.mxu0 %v118_v15  ;;  %177 = vmatpush.msra.mxu3 %v166_v28  ;;  %v225_v59 = vld [vmem:[%s426_s8] ss:$0 sm:$0xff] }
  0x11   :  { %206 = vmatmul.msk.f32.gmra.mxu1 %vm71_vm1, %v33_v14  ;;  %214 = vmatpush.msra.mxu2 %v117_v16 }
  0x12   :  { %136 = vmatpush.msrb.mxu0 %v117_v16  ;;  %178 = vmatpush.msra.mxu3 %v165_v29 }
  0x13   :  { %215 = vmatpush.msra.mxu2 %v116_v17 }
  0x14   :  { %137 = vmatpush.msrb.mxu0 %v116_v17  ;;  %179 = vmatpush.msra.mxu3 %v164_v30 }
  0x15   :  { %216 = vmatpush.msra.mxu2 %v115_v18 }
  0x16   :  { %138 = vmatpush.msrb.mxu0 %v115_v18  ;;  %180 = vmatpush.msra.mxu3 %v163_v31 }
  0x17   :  { %217 = vmatpush.msra.mxu2 %v114_v19 }
  0x18   :  { %139 = vmatpush.msrb.mxu0 %v114_v19  ;;  %181 = vmatpush.msra.mxu3 %v162_v32 }
  0x19   :  { %218 = vmatpush.msra.mxu2 %v113_v20 }
  0x1a   :  { %140 = vmatpush.msrb.mxu0 %v113_v20  ;;  %182 = vmatpush.msra.mxu3 %v161_v34 }
  0x1b   :  { %219 = vmatpush.msra.mxu2 %v112_v21 }
  0x1c   :  { %141 = vmatpush.msrb.mxu0 %v112_v21  ;;  %183 = vmatpush.msra.mxu3 %v160_v36 }
  0x1d   :  { %220 = vmatpush.msra.mxu2 %v111_v22 }
  0x1e   :  { %142 = vmatpush.msrb.mxu0 %v111_v22  ;;  %184 = vmatpush.msra.mxu3 %v159_v39 }
  0x1f   :  { %221 = vmatpush.msra.mxu2 %v110_v23 }
  0x20   :  { %143 = vmatpush.msrb.mxu0 %v110_v23  ;;  %185 = vmatpush.msra.mxu3 %v158_v41 }
  0x21   :  { %222 = vmatpush.msra.mxu2 %v109_v24 }
  0x22   :  { %144 = vmatpush.msrb.mxu0 %v109_v24  ;;  %186 = vmatpush.msra.mxu3 %v157_v43 }
  0x24   :  { %187 = vmatpush.msra.mxu3 %v156_v49 }
  0x26   :  { %188 = vmatpush.msra.mxu3 %v155_v50 }
  0x28   :  { %189 = vmatpush.msra.mxu3 %v154_v51 }
  0x80   :  { %v65_v33 = vpop.f32.mrf.mxu0 }
  0x86   :  { %v95_v37 = vpop.f32.mrf.mxu1 }
  0x87   :  { %v96_v38 = vadd.f32 %v95_v37, %v65_v33 }
  0x88   :  { %v68_v44 = vpop.f32.mrf.mxu0 }
  0x89   :  { %v105_v40 = vadd.f32 %v223_v35, %v96_v38 }
  0x8b   :  { %v107_v42 = vmax.f32 %v105_v40, 0.0 }
  0x8d   :  { %145 = vmatmul.f32.vlgmr.msrb.gmra.mxu0 %v107_v42 }
  0x8e   :  { %v98_v45 = vpop.f32.mrf.mxu1 }
  0x8f   :  { %v99_v46 = vadd.f32 %v98_v45, %v68_v44 }
  0x91   :  { %v106_v47 = vadd.f32 %v223_v35, %v99_v46 }
  0x93   :  { %v108_v48 = vmax.f32 %v106_v47, 0.0 }
  0x95   :  { %148 = vmatmul.f32.vlgmr.msra.gmra.mxu2 %v108_v48 }
 0x10a   :  { %v146_v53 = vpop.f32.mrf.mxu0 }
 0x10b   :  { %v147_v54 = vadd.f32 %v224_v52, %v146_v53 }
 0x10d   :  { %v152_v55 = vmax.f32 %v147_v54, 0.0 }
 0x10f   :  { %190 = vmatmul.f32.vlgmr.msra.gmra.mxu3 %v152_v55 }
 0x118   :  { %v149_v56 = vpop.f32.mrf.mxu2 }
 0x119   :  { %v150_v57 = vadd.f32 %v224_v52, %v149_v56 }
 0x11b   :  { %v153_v58 = vmax.f32 %v150_v57, 0.0 }
 0x11d   :  { %193 = vmatmul.f32.gmra.mxu3 %v153_v58 }
 0x192   :  { %v191_v60 = vpop.f32.mrf.mxu3 }
 0x193   :  { %v192_v61 = vadd.f32 %v225_v59, %v191_v60 }
 0x195   :  { %197 = vst [vmem:[%s427_s9] sm:$0xff] %v192_v61 }
 0x1a0   :  { %v194_v62 = vpop.f32.mrf.mxu3 }
 0x1a1   :  { %v195_v63 = vadd.f32 %v225_v59, %v194_v62 }
 0x1a3   :  { %198 = vst [vmem:[%s427_s9 + $0x8] sm:$0xff] %v195_v63 }

</bundles_post_ra>
